<compile_context>
chip_gen: v7x
topology: tpu7x:2x2x1
jax: 0.10.0
libtpu: 0.0.40
codegen_flags: <defaults>
</compile_context>

<pallas_src>
import numpy as np
import jax
import jax.numpy as jnp
from jax.experimental import pallas as pl
from jax.experimental.pallas import tpu as pltpu


# ----------------------------- helpers -------------------------------------

def _round_up(x, m):
    return ((x + m - 1) // m) * m


def _pad2d(x, rows, cols):
    return jnp.pad(x, ((0, rows - x.shape[0]), (0, cols - x.shape[1])))


def _sigmoid(x):
    # sigmoid(x) == 0.5 * tanh(0.5 * x) + 0.5  -- single EUP push per element.
    return 0.5 * jnp.tanh(0.5 * x) + 0.5


def _vmem_budget_bytes():
    """Generation-aware VMEM budget (~75% of physical VMEM)."""
    try:
        cap = int(pltpu.get_tpu_info().vmem_capacity_bytes)
    except Exception:
        cap = 64 * 1024 * 1024          # conservative fallback (v7x per-TC VMEM)
    return (cap * 3) // 4


# ----------------------------- kernels -------------------------------------

def cdgk_stu_conc_kernel(stu_emb_ref,   # (TB, E)  selected student embeddings
                         w1_ref,        # (E, Cp)  emb2conc weight
                         b1_ref,        # (1, Cp)  emb2conc bias row (f32)
                         out_ref):      # (TB, Cp) stu_c (out dtype = f32 or mm)
    out_ref[...] = _sigmoid(
        jnp.dot(stu_emb_ref[...], w1_ref[...],
                preferred_element_type=jnp.float32) + b1_ref[...]
    ).astype(out_ref.dtype)


def cdgk_item_prep_kernel(w1t_ref,    # (Cp, E)   emb2conc weight, transposed
                          b1c_ref,    # (Cp, 1)   emb2conc bias, column (f32)
                          w2c_ref,    # (Cp, 1)   pred_layer weight, column (f32)
                          qwc_ref,    # (Cp, 1)   guess_adju_layer1_Q_w column (f32)
                          iembt_ref,  # (E, TI)   item embeddings, transposed
                          qt_ref,     # (Cp, TI)  Q^T tile (f32)
                          disc_ref,   # (1, TI)   discrimination row (f32)
                          qw2t_ref,   # (Cp, TI)  out: (Q * w2)^T (mm dtype)
                          vec_ref):   # (8, TI)   out: [disc; corr; qadj; 0...] f32
    """Batch-invariant item-side precompute (concept on sublanes, item on lanes)."""
    item_c_t = _sigmoid(
        jnp.dot(w1t_ref[...], iembt_ref[...],
                preferred_element_type=jnp.float32) + b1c_ref[...])      # (Cp, TI)
    qt = qt_ref[...]                                                     # (Cp, TI) f32
    qw2t = qt * w2c_ref[...]                                             # (Cp, TI) f32
    qw2t_ref[...] = qw2t.astype(qw2t_ref.dtype)
    corr = jnp.sum(qw2t * item_c_t, axis=0, keepdims=True)               # (1, TI)
    qadj = jnp.sum(qt * qwc_ref[...], axis=0, keepdims=True)             # (1, TI)
    vec_ref[...] = jnp.zeros_like(vec_ref)
    vec_ref[0:1, :] = disc_ref[...]
    vec_ref[1:2, :] = corr
    vec_ref[2:3, :] = qadj


def cdgk_main_kernel(scal_ref,      # SMEM (3,): [b2, w3, b3]
                     stu_c_ref,     # (TB, Cp)  precomputed stu_c (mm dtype)
                     stu_adju_ref,  # (TB, 1)   selected guess_adju stu weights (f32)
                     qw2t_ref,      # (Cp, TI)  (Q * w2)^T tile (mm dtype)
                     vec_ref,       # (8, TI)   packed [disc; corr; qadj] (f32)
                     out_ref):      # (TB, TI)  prediction tile (f32)
    b2 = scal_ref[0]
    w3 = scal_ref[1]
    b3 = scal_ref[2]

    # folded pred_layer: one MXU matmul + per-item vector correction
    s = jnp.dot(stu_c_ref[...], qw2t_ref[...],
                preferred_element_type=jnp.float32)                      # (TB, TI)
    disc = vec_ref[0:1, :]
    corr = vec_ref[1:2, :]
    qadj = vec_ref[2:3, :]
    P = _sigmoid(disc * (s - corr) + b2)

    # guess-adjustment path (pure VPU/EUP on the (TB, TI) tile)
    g1 = _sigmoid(stu_adju_ref[...] + qadj)
    g2 = _sigmoid(w3 * g1 + b3)

    out_ref[...] = g2 + (1.0 - g2) * P


# ----------------------------- wrapper --------------------------------------

def cdgk_forward(stu_list, params, return_cogn_state=False, use_bf16=False):
    f32 = jnp.float32
    mm_dt = jnp.bfloat16 if use_bf16 else f32
    mm_bytes = 2 if use_bf16 else 4

    idx = jnp.asarray(stu_list, jnp.int32) - 1             # torch ids are 1-based
    # TODO(synk): for very large batches / embedding tables, gather student
    # rows in-kernel via PrefetchScalarGridSpec + pl.Element(1) instead of
    # this (tiny) XLA gather.
    stu_emb_sel = params["stu_emb"][idx]                   # (B, E)
    stu_adju_sel = params["stu_w"][idx]                    # (B, 1)

    B, E = stu_emb_sel.shape
    item_num, conc_num = params["Q"].shape

    # ---- tile sizing (generation-aware VMEM budget) ----
    budget = _vmem_budget_bytes()
    row_mult = 16 if use_bf16 else 8                       # bf16 packs 16 rows/vreg
    tb_cap = 256 if use_bf16 else 128
    TB = min(tb_cap, _round_up(max(B, 1), row_mult))
    B_pad = _round_up(B, TB)
    Cp = _round_up(conc_num, 128)
    I_pad = _round_up(item_num, 128)

    def _main_ws(ti):
        # double-buffered VMEM blocks of the main kernel
        return 2 * (TB * Cp * mm_bytes        # stu_c tile
                    + TB * 4                  # stu_adju tile
                    + Cp * ti * mm_bytes      # qw2t tile
                    + 8 * ti * 4              # packed disc/corr/qadj
                    + TB * ti * 4)            # output tile

    def _prep_ws(ti):
        return 2 * (Cp * E * mm_bytes + 3 * Cp * 4 + E * ti * mm_bytes
                    + Cp * ti * 4 + ti * 4
                    + Cp * ti * mm_bytes + 8 * ti * 4)

    TI = 128
    for cand in (2048, 1024, 512, 256, 128):
        if I_pad % cand == 0 and max(_main_ws(cand), _prep_ws(cand)) <= budget:
            TI = cand
            break
    n_i = I_pad // TI
    n_b = B_pad // TB

    cparams_1d = pltpu.CompilerParams(dimension_semantics=("parallel",),
                                      vmem_limit_bytes=budget)

    # ---- layout plumbing only (pads / transposes / casts) ----
    w1 = _pad2d(params["w1"].astype(f32), E, Cp)                    # (E, Cp)
    b1_row = _pad2d(params["b1"].astype(f32), 1, Cp)                # (1, Cp)
    w1_mm = w1.astype(mm_dt)
    stu_emb_p = _pad2d(stu_emb_sel.astype(mm_dt), B_pad, E)         # (B_pad, E)

    # ---- kernel A: batch-wide stu_c = sigmoid(stu_emb @ w1 + b1) ----
    def _stu_conc(out_dtype):
        return pl.pallas_call(
            cdgk_stu_conc_kernel,
            out_shape=jax.ShapeDtypeStruct((B_pad, Cp), out_dtype),
            grid=(n_b,),
            in_specs=[pl.BlockSpec((TB, E), lambda b: (b, 0)),
                      pl.BlockSpec((E, Cp), lambda b: (0, 0)),
                      pl.BlockSpec((1, Cp), lambda b: (0, 0))],
            out_specs=pl.BlockSpec((TB, Cp), lambda b: (b, 0)),
            compiler_params=cparams_1d,
        )(stu_emb_p, w1_mm, b1_row)

    if return_cogn_state:
        cogn = _stu_conc(f32)
        return cogn[:B, :conc_num]

    stu_c = _stu_conc(mm_dt)                                        # (B_pad, Cp)
    stu_adju_p = _pad2d(stu_adju_sel.astype(f32), B_pad, 1)         # (B_pad, 1)

    # item-side arrays in concept-on-sublane / item-on-lane layout
    w1_t = w1.T.astype(mm_dt)                                       # (Cp, E)
    b1_col = b1_row.T                                               # (Cp, 1)
    w2_col = _pad2d(params["w2"].astype(f32), 1, Cp).T              # (Cp, 1)
    qw_col = _pad2d(params["qw"].astype(f32), 1, Cp).T              # (Cp, 1)
    item_emb_t = _pad2d(params["item_emb"].astype(f32),
                        I_pad, E).T.astype(mm_dt)                   # (E, I_pad)
    q_t = _pad2d(params["Q"].astype(f32), I_pad, Cp).T              # (Cp, I_pad)
    disc_row = _pad2d(params["disc"].astype(f32), I_pad, 1).T       # (1, I_pad)

    # ---- kernel B: batch-invariant item precompute (gridded over items) ----
    qw2t, vec = pl.pallas_call(
        cdgk_item_prep_kernel,
        out_shape=(jax.ShapeDtypeStruct((Cp, I_pad), mm_dt),
                   jax.ShapeDtypeStruct((8, I_pad), f32)),
        grid=(n_i,),
        in_specs=[pl.BlockSpec((Cp, E), lambda i: (0, 0)),
                  pl.BlockSpec((Cp, 1), lambda i: (0, 0)),
                  pl.BlockSpec((Cp, 1), lambda i: (0, 0)),
                  pl.BlockSpec((Cp, 1), lambda i: (0, 0)),
                  pl.BlockSpec((E, TI), lambda i: (0, i)),
                  pl.BlockSpec((Cp, TI), lambda i: (0, i)),
                  pl.BlockSpec((1, TI), lambda i: (0, i))],
        out_specs=(pl.BlockSpec((Cp, TI), lambda i: (0, i)),
                   pl.BlockSpec((8, TI), lambda i: (0, i))),
        compiler_params=cparams_1d,
    )(w1_t, b1_col, w2_col, qw_col, item_emb_t, q_t, disc_row)

    # true scalars go to SMEM
    scal = jnp.array([params["b2"][0, 0], params["w3"][0, 0],
                      params["b3"][0, 0]], dtype=f32)

    # ---- kernel C: main prediction, item OUTER / batch INNER grid ----
    # Item-side blocks (qw2t, vec) keep the same block index across the inner
    # batch loop -> Pallas skips their re-DMA; the (Cp, I_pad) matrix is read
    # from HBM exactly once per outer step.
    out = pl.pallas_call(
        cdgk_main_kernel,
        out_shape=jax.ShapeDtypeStruct((B_pad, I_pad), f32),
        grid=(n_i, n_b),
        in_specs=[pl.BlockSpec(memory_space=pltpu.MemorySpace.SMEM),
                  pl.BlockSpec((TB, Cp), lambda i, b: (b, 0)),
                  pl.BlockSpec((TB, 1), lambda i, b: (b, 0)),
                  pl.BlockSpec((Cp, TI), lambda i, b: (0, i)),
                  pl.BlockSpec((8, TI), lambda i, b: (0, i))],
        out_specs=pl.BlockSpec((TB, TI), lambda i, b: (b, i)),
        compiler_params=pltpu.CompilerParams(
            dimension_semantics=("parallel", "arbitrary"),
            vmem_limit_bytes=budget),
    )(scal, stu_c, stu_adju_p, qw2t, vec)

    return out[:B, :item_num]


# ----------------------------- reference ------------------------------------

def cdgk_reference(stu_list, p):
    """Pure-JAX replica of the PyTorch per-student loop, for verification."""
    idx = np.asarray(stu_list) - 1
    item_c = jax.nn.sigmoid(p["item_emb"] @ p["w1"] + p["b1"])      # (item, conc)
    q_adju = p["Q"] @ p["qw"].T                                     # (item, 1)
    rows = []
    for b in range(len(idx)):
        stu_c = jax.nn.sigmoid(p["stu_emb"][idx[b]] @ p["w1"] + p["b1"][0])
        X = p["Q"] * (stu_c - item_c) * p["disc"]                   # (item, conc)
        P = jax.nn.sigmoid(X @ p["w2"].T + p["b2"])                 # (item, 1)
        g1 = jax.nn.sigmoid(p["stu_w"][idx[b]] + q_adju)            # (item, 1)
        g2 = jax.nn.sigmoid(g1 * p["w3"][0, 0] + p["b3"][0, 0])
        Y = g2 + (1.0 - g2) * P
        rows.append(Y.reshape(-1))
    return jnp.stack(rows)


def make_params(key, stu_num, item_num, conc_num, emb_dim):
    ks = jax.random.split(key, 12)
    f32 = jnp.float32
    return {
        "stu_emb":  jax.random.normal(ks[0], (stu_num, emb_dim), f32),
        "item_emb": jax.random.normal(ks[1], (item_num, emb_dim), f32),
        "disc":     jax.random.normal(ks[2], (item_num, 1), f32),
        "Q":        jax.random.bernoulli(ks[3], 0.5, (item_num, conc_num)).astype(f32),
        # emb2conc Linear(emb_dim, conc_num): stored pre-transposed (in, out)
        "w1":       jax.random.normal(ks[4], (emb_dim, conc_num), f32) * 0.2,
        "b1":       jax.random.normal(ks[5], (1, conc_num), f32) * 0.1,
        # pred_layer Linear(conc_num, 1): torch layout (out=1, in=conc_num)
        "w2":       jax.random.normal(ks[6], (1, conc_num), f32) * 0.2,
        "b2":       jax.random.normal(ks[7], (1, 1), f32) * 0.1,
        "stu_w":    jax.random.normal(ks[8], (stu_num, 1), f32),
        # guess_adju_layer1_Q_w (conc_num, 1) stored transposed as (1, conc_num)
        "qw":       jax.random.normal(ks[9], (1, conc_num), f32),
        # guess_adju_layer2 Linear(1, 1)
        "w3":       jax.random.normal(ks[10], (1, 1), f32),
        "b3":       jax.random.normal(ks[11], (1, 1), f32),
    }
# NOTE: NoneNegClipper / apply_clipper is a training-time weight clamp and is
# not part of the forward pass, so it is not implemented here.


if __name__ == "__main__":
    # Small but multi-tile shapes: item grid has 3 tiles, batch grid has 1.
    stu_num, item_num, conc_num, emb_dim = 20, 300, 12, 32
    key = jax.random.PRNGKey(0)
    params = make_params(key, stu_num, item_num, conc_num, emb_dim)

    stu_list = jnp.array([1, 3, 5, 8, 12, 20], dtype=jnp.int32)    # 1-indexed, B=6
    ref = cdgk_reference(stu_list, params)

    # f32 path: tight tolerance vs the per-student reference
    out = jax.block_until_ready(cdgk_forward(stu_list, params))
    np.testing.assert_allclose(np.asarray(out), np.asarray(ref),
                               rtol=2e-5, atol=2e-5)
    assert out.shape == (6, item_num)

    # bf16 matmul-operand path (MXU-native on v6e/v7x): looser tolerance
    out_bf16 = jax.block_until_ready(
        cdgk_forward(stu_list, params, use_bf16=True))
    np.testing.assert_allclose(np.asarray(out_bf16), np.asarray(ref),
                               rtol=0.0, atol=6e-2)

    # return_cogn_state branch
    cogn = jax.block_until_ready(
        cdgk_forward(stu_list, params, return_cogn_state=True))
    cogn_ref = jax.nn.sigmoid(params["stu_emb"][stu_list - 1] @ params["w1"]
                              + params["b1"])
    np.testing.assert_allclose(np.asarray(cogn), np.asarray(cogn_ref),
                               rtol=2e-5, atol=2e-5)

    print("KERNEL_OK")
</pallas_src>

<mosaic_0001>
module attributes {stable_mosaic.version = 11 : i64} {
  func.func @cdgk_stu_conc_kernel(%arg0: i32, %arg1: memref<8x32xf32, #tpu.memory_space<vmem>>, %arg2: memref<32x128xf32, #tpu.memory_space<vmem>>, %arg3: memref<1x128xf32, #tpu.memory_space<vmem>>, %arg4: memref<8x128xf32, #tpu.memory_space<vmem>>) attributes {dimension_semantics = [#tpu.dimension_semantics<parallel>], iteration_bounds = array<i64: 1>, scalar_prefetch = 0 : i64, scratch_operands = 0 : i64, tpu.core_type = #tpu.core_type<tc>, window_params = [{transform_indices = @transform_0, window_bounds = array<i64: 8, 32>}, {pipeline_mode = #tpu.pipeline_mode<synchronous>, transform_indices = @transform_1, window_bounds = array<i64: 32, 128>}, {pipeline_mode = #tpu.pipeline_mode<synchronous>, transform_indices = @transform_2, window_bounds = array<i64: 1, 128>}, {transform_indices = @transform_3, window_bounds = array<i64: 8, 128>}]} {
    %c0 = arith.constant 0 : index
    %c0_0 = arith.constant 0 : index
    %0 = vector.load %arg1[%c0, %c0_0] : memref<8x32xf32, #tpu.memory_space<vmem>>, vector<8x32xf32>
    %c0_1 = arith.constant 0 : index
    %c0_2 = arith.constant 0 : index
    %1 = vector.load %arg2[%c0_1, %c0_2] : memref<32x128xf32, #tpu.memory_space<vmem>>, vector<32x128xf32>
    %cst = arith.constant dense<0.000000e+00> : vector<8x128xf32>
    %2 = tpu.matmul %0, %1, %cst {dimension_numbers = #tpu.dot_dimension_numbers<[1], [0], [0], [1], [0, 0, 1, 1], [], []>} : vector<8x32xf32>, vector<32x128xf32>, vector<8x128xf32> -> vector<8x128xf32>
    %c0_3 = arith.constant 0 : index
    %c0_4 = arith.constant 0 : index
    %3 = vector.load %arg3[%c0_3, %c0_4] : memref<1x128xf32, #tpu.memory_space<vmem>>, vector<1x128xf32>
    %4 = vector.broadcast %3 : vector<1x128xf32> to vector<8x128xf32>
    %5 = arith.addf %2, %4 : vector<8x128xf32>
    %cst_5 = arith.constant 5.000000e-01 : f32
    %6 = vector.broadcast %cst_5 : f32 to vector<8x128xf32>
    %7 = arith.mulf %6, %5 : vector<8x128xf32>
    %8 = math.tanh %7 : vector<8x128xf32>
    %cst_6 = arith.constant 5.000000e-01 : f32
    %9 = vector.broadcast %cst_6 : f32 to vector<8x128xf32>
    %10 = arith.mulf %9, %8 : vector<8x128xf32>
    %cst_7 = arith.constant 5.000000e-01 : f32
    %11 = vector.broadcast %cst_7 : f32 to vector<8x128xf32>
    %12 = arith.addf %10, %11 : vector<8x128xf32>
    %c0_8 = arith.constant 0 : index
    %c0_9 = arith.constant 0 : index
    %13 = vector.load %arg4[%c0_8, %c0_9] : memref<8x128xf32, #tpu.memory_space<vmem>>, vector<8x128xf32>
    tpu.vector_store %arg4[%c0_8, %c0_9], %12 {strides = array<i32>} : memref<8x128xf32, #tpu.memory_space<vmem>>, vector<8x128xf32>,
    return
  }
  func.func @transform_0(%arg0: i32) -> (i32, i32) {
    %c0_i32 = arith.constant 0 : i32
    %c0_i32_0 = arith.constant 0 : i32
    return %arg0, %c0_i32 : i32, i32
  }
  func.func @transform_1(%arg0: i32) -> (i32, i32) {
    %c0_i32 = arith.constant 0 : i32
    %c0_i32_0 = arith.constant 0 : i32
    %c0_i32_1 = arith.constant 0 : i32
    return %c0_i32, %c0_i32_0 : i32, i32
  }
  func.func @transform_2(%arg0: i32) -> (i32, i32) {
    %c0_i32 = arith.constant 0 : i32
    %c0_i32_0 = arith.constant 0 : i32
    %c0_i32_1 = arith.constant 0 : i32
    return %c0_i32, %c0_i32_0 : i32, i32
  }
  func.func @transform_3(%arg0: i32) -> (i32, i32) {
    %c0_i32 = arith.constant 0 : i32
    %c0_i32_0 = arith.constant 0 : i32
    return %arg0, %c0_i32 : i32, i32
  }
}

</mosaic_0001>

<bundles_post_ra>
// kernel: tpu_custom_call.1
= control target key start
LH: loop header
LB: loop body
LE: loop exit
PB: predicated region body
PF: predicated region fallthrough
CT: control target
= control target key end

     0   :  { %8 = vsyncpa [#allocation3], 0  ;;  %s328_s0 = inlined_call_operand.hbm [shape: f32[8,32], index: 0, kind: input, shape index: {}]   ;;  %s329_s1 = inlined_call_operand.hbm [shape: f32[32,128], index: 1, kind: input, shape index: {}]   ;;  %s330_s2 = inlined_call_operand.vmem [shape: f32[1,128], index: 2, kind: input, shape index: {}]   ;;  %s331_s3 = inlined_call_operand.hbm [shape: f32[8,128], index: 3, kind: output, shape index: {}]  }
   0x1   :  { %9 = vsyncpa [#allocation6], 0 }
   0x2   :  { %10 = vsyncpa [#allocation4], 0  ;;  %s254_s12 = smov [#allocation2]   ;;  %s255_s14 = smov [#allocation5]  }
   0x3   :  { %s17_s13 = sshll.u32 %s254_s12, 4  ;;  %s26_s15 = sshll.u32 %s255_s14, 4  ;;  %s18_s13 = int_to_ptr.vmem [resolvable:$true] %s17_s13  ;;  %s282_s15 = int_to_ptr.vmem [resolvable:$true] %s26_s15 }
   0x4   :  { %s182_s18 = scalar_lea.hbm %s328_s0, 128 }
   0x5   :  { %p183_p0 = scmp.ne.s32.totalorder %s328_s0, %s182_s18  ;;  %p186_p1 = scmp.lt.u32.totalorder %s182_s18, %s328_s0 }
   0x7   :  { %p188_p2 = pnand %p186_p1, %p183_p0 }
   0x9   :  { %191 = shalt.err (!%p188_p2)
}
   0xa   :  { %s192_s23 = scalar_lea.vmem %s18_s13, 128  ;;  %p197_p4 = scmp.lt.s32.totalorder %s18_s13, %s18_s13 }
   0xb   :  { %p193_p3 = scmp.ne.s32.totalorder %s18_s13, %s192_s23  ;;  %p198_p5 = scmp.lt.s32.totalorder %s192_s23, %s192_s23 }
   0xd   :  { %p199_p6 = por %p198_p5, %p197_p4 }
   0xf   :  { %p200_p7 = pnand %p199_p6, %p193_p3 }
  0x11   :  { %203 = shalt.err (!%p200_p7)
}
  0x12   :  { %20 = dma.hbm_to_vmem [thread:$0]  %s328_s0, 128, %s18_s13, [#allocation3]  }
  0x13   :  { %s204_s28 = scalar_lea.hbm %s329_s1, 512 }
  0x14   :  { %p205_p8 = scmp.ne.s32.totalorder %s329_s1, %s204_s28  ;;  %p208_p9 = scmp.lt.u32.totalorder %s204_s28, %s329_s1 }
  0x16   :  { %p210_p10 = pnand %p208_p9, %p205_p8 }
  0x18   :  { %213 = shalt.err (!%p210_p10)
}
  0x19   :  { %s214_s6 = scalar_lea.vmem %s282_s15, 512  ;;  %p219_p12 = scmp.lt.s32.totalorder %s282_s15, %s282_s15 }
  0x1a   :  { %p215_p11 = scmp.ne.s32.totalorder %s282_s15, %s214_s6  ;;  %p220_p13 = scmp.lt.s32.totalorder %s214_s6, %s214_s6 }
  0x1c   :  { %p221_p0 = por %p220_p13, %p219_p12 }
  0x1e   :  { %p222_p1 = pnand %p221_p0, %p215_p11 }
  0x20   :  { %225 = shalt.err (!%p222_p1)
}
  0x21   :  { %s256_s0 = smov 128   ;;  %s257_s7 = smov 8  }
  0x22   :  { %32 = dma.hbm_to_vmem [thread:$0]  %s329_s1, 512, %s282_s15, [#allocation6], %s256_s0, %s256_s0, %s257_s7  }
  0x23   :  { %248 = dma.done.wait [#allocation3], 128  }
  0x24   :  { %249 = vsyncadd [#allocation3], 4294967168 }
  0x25   :  { %250 = dma.done.wait [#allocation6], 512  }
  0x26   :  { %251 = vsyncadd [#allocation6], 4294966784  ;;  %v258_v0 = vmov 0.0|0.0   ;;  %vm259_vm0 = vmmov 0   ;;  %v260_v1 = vmov 0.0   ;;  %v42_v2 = vld [vmem:[#allocation5] sm:$0xff] }
  0x27   :  { %166 = vmatprep.subr.bf16.mxu0 %v258_v0  ;;  %163 = vmatprep.mubr.msk.f32.mxu0 %vm259_vm0, %v260_v1  ;;  %v43_v3 = vld [vmem:[#allocation5 + $0x8] sm:$0xff]  ;;  %v44_v4 = vld [vmem:[#allocation5 + $0x10] sm:$0xff]  ;;  %v45_v6 = vld [vmem:[#allocation5 + $0x18] sm:$0xff]  ;;  %vm53_vm1 = vcmask 261120   ;;  %s261_s11 = smov [#allocation7]  }
  0x28   :  { %v167_v5 = vpack.c.bf16 %v43_v3, %v42_v2  ;;  %v170_v7 = vpack.c.bf16 %v45_v6, %v44_v4  ;;  %v41_v8 = vld [vmem:[#allocation2] sm:$0xff]  ;;  %s138_s12 = sshll.u32 %s261_s11, 4  ;;  %s139_s12 = int_to_ptr.vmem [resolvable:$true] %s138_s12 }
  0x29   :  { %v148_v9 = vld [vmem:[%s330_s2] ss:$0 sm:$0xff]  ;;  %s226_s13 = scalar_lea.vmem %s139_s12, 128  ;;  %p231_p3 = scmp.lt.s32.totalorder %s139_s12, %s139_s12 }
  0x2a   :  { %168 = vmatpush3.bf16.msra.mxu0 %v167_v5  ;;  %p227_p2 = scmp.ne.s32.totalorder %s139_s12, %s226_s13  ;;  %p232_p4 = scmp.lt.s32.totalorder %s226_s13, %s226_s13 }
  0x2b   :  { %169 = vmatprep.subr.bf16.mxu0 %v258_v0 }
  0x2c   :  { %p233_p5 = por %p232_p4, %p231_p3 }
  0x2e   :  { %171 = vmatpush3.bf16.msra.mxu0 %v170_v7  ;;  %p234_p6 = pnand %p233_p5, %p227_p2 }
  0x31   :  { %164 = vmatmul.mubr.msk.f32.vlgmr.msra.gmra.mrb[0].mxu0 %vm53_vm1, %v41_v8 }
 0x104   :  { %v123_v10 = vpop.f32.mrb[0].mxu0 }
 0x105   :  { %v124_v11 = vadd.f32 %v148_v9, %v123_v10  ;;  %v165_v12 = vpop.f32.mrb[1].mxu0 }
 0x107   :  { %v127_v13 = vmul.f32 0.5, %v124_v11 }
 0x109   :  { %180 = vtanh.f32 %v127_v13 }
 0x113   :  { %v181_v14 = vpop.eup %180 }
 0x114   :  { %v129_v15 = vmul.f32 0.5, %v181_v14 }
 0x116   :  { %v130_v16 = vadd.f32 0.5, %v129_v15 }
 0x118   :  { %131 = vst [vmem:[#allocation7] sm:$0xff] %v130_v16 }
 0x119   :  { %237 = shalt.err (!%p234_p6)
}
 0x11a   :  { %s238_s15 = scalar_lea.hbm %s331_s3, 128 }
 0x11b   :  { %p239_p7 = scmp.ne.s32.totalorder %s331_s3, %s238_s15  ;;  %p242_p8 = scmp.lt.u32.totalorder %s238_s15, %s331_s3 }
 0x11d   :  { %p244_p9 = pnand %p242_p8, %p239_p7 }
 0x11f   :  { %247 = shalt.err (!%p244_p9)
}
 0x120   :  { %141 = dma.vmem_to_hbm [thread:$0]  %s139_s12, 128, %s331_s3, [#allocation4]  }
 0x121   :  { %252 = dma.done.wait [#allocation4], 128  }
 0x122   :  { %253 = vsyncadd [#allocation4], 4294967168 }
 0x123   :  { %145 = vsyncpa [#allocation3], 1 }
 0x124   :  { %146 = vsyncpa [#allocation6], 1 }
 0x125   :  { %147 = vsyncpa [#allocation4], 1 }

</bundles_post_ra>
